<compile_context>
chip_gen: v7x
topology: tpu7x:2x2x1
jax: 0.10.0
libtpu: 0.0.40
codegen_flags: <defaults>
</compile_context>

<pallas_src>
import jax
import jax.numpy as jnp
from jax.experimental import pallas as pl
from jax.experimental.pallas import tpu as pltpu

INPUT_DIM = 8
HIDDEN_DIM = 64


def _round_up(n, m):
    return (n + m - 1) // m * m


def mlp_kernel(x_ref, w1_ref, b1_ref, w2_ref, b2_ref, w3t_ref, b3_ref, o_ref):
    tb = x_ref.shape[0]
    # Row-chunking keeps live intermediates small (vregs, not VMEM spills).
    chunk = 256 if tb % 256 == 0 else (128 if tb % 128 == 0 else tb)

    w1 = w1_ref[...]        # (8, 64)   bf16
    b1 = b1_ref[...]        # (1, 64)   f32
    w2 = w2_ref[...]        # (64, 64)  bf16
    b2 = b2_ref[...]        # (1, 64)   f32
    w3t = w3t_ref[...]      # (1, 64)   bf16   (transposed last-layer weight)
    b3 = b3_ref[0, 0]       # scalar    f32    (SMEM)

    for c in range(tb // chunk):
        rows = pl.ds(c * chunk, chunk)
        x = x_ref[rows, :]                                            # (chunk, 8) bf16
        h1 = jnp.dot(x, w1, preferred_element_type=jnp.float32) + b1  # f32 accumulate
        h1 = jnp.maximum(h1, 0.0).astype(jnp.bfloat16)                # (chunk, 64)
        h2 = jnp.dot(h1, w2, preferred_element_type=jnp.float32) + b2
        h2 = jnp.maximum(h2, 0.0).astype(jnp.bfloat16)                # (chunk, 64)
        # Final layer computed transposed: (1,64) x (chunk,64)^T -> (1, chunk),
        # so the store is lane-dense instead of a (chunk,1) masked column store.
        out_t = jax.lax.dot_general(
            w3t, h2,
            dimension_numbers=(((1,), (1,)), ((), ())),
            preferred_element_type=jnp.float32) + b3                  # (1, chunk) f32
        o_ref[0, :, pl.ds(c * chunk, chunk)] = out_t.astype(o_ref.dtype)


def mlp_forward(x, params, *, tb=512):
    """x: (B, INPUT_DIM) float32. Returns (B, 1) float32."""
    w1, b1, w2, b2, w3, b3 = params
    B, D = x.shape
    assert D == INPUT_DIM

    # ---- choose batch tile --------------------------------------------------
    tb = _round_up(max(tb, 128), 128)
    b_pad = _round_up(B, 128)
    tb = min(tb, b_pad)
    # keep >= 2 grid steps when the batch allows it so both of v7x's two
    # TensorCores get work (no effect on single-TC v5e/v6e).
    if b_pad // tb < 2 and b_pad >= 256:
        tb = _round_up(B, 256) // 2
    b_pad = _round_up(B, tb)
    grid_len = b_pad // tb

    # ---- prepare inputs (bf16 matmul operands, f32 biases) ------------------
    x_in = x.astype(jnp.bfloat16)
    if b_pad != B:
        x_in = jnp.concatenate(
            [x_in, jnp.zeros((b_pad - B, D), jnp.bfloat16)], axis=0)

    w1b = w1.astype(jnp.bfloat16)                 # (8, 64)
    w2b = w2.astype(jnp.bfloat16)                 # (64, 64)
    w3t = w3.T.astype(jnp.bfloat16)               # (1, 64)
    b1f = b1.astype(jnp.float32)                  # (1, 64)
    b2f = b2.astype(jnp.float32)                  # (1, 64)
    b3f = b3.reshape(1, 1).astype(jnp.float32)    # (1, 1) scalar, goes to SMEM

    flops = 2 * b_pad * (INPUT_DIM * HIDDEN_DIM
                         + HIDDEN_DIM * HIDDEN_DIM
                         + HIDDEN_DIM * 1)
    bytes_accessed = (x_in.size * 2 + b_pad * 4
                      + (w1b.size + w2b.size + w3t.size) * 2
                      + (b1f.size + b2f.size + b3f.size) * 4)
    cost = pl.CostEstimate(flops=flops, transcendentals=0,
                           bytes_accessed=bytes_accessed)

    out3 = pl.pallas_call(
        mlp_kernel,
        out_shape=jax.ShapeDtypeStruct((grid_len, 1, tb), jnp.float32),
        grid_spec=pltpu.PrefetchScalarGridSpec(
            num_scalar_prefetch=0,
            grid=(grid_len,),
            in_specs=[
                pl.BlockSpec((tb, INPUT_DIM), lambda i: (i, 0)),            # x tile
                pl.BlockSpec((INPUT_DIM, HIDDEN_DIM), lambda i: (0, 0)),    # W1
                pl.BlockSpec((1, HIDDEN_DIM), lambda i: (0, 0)),            # b1
                pl.BlockSpec((HIDDEN_DIM, HIDDEN_DIM), lambda i: (0, 0)),   # W2
                pl.BlockSpec((1, HIDDEN_DIM), lambda i: (0, 0)),            # b2
                pl.BlockSpec((1, HIDDEN_DIM), lambda i: (0, 0)),            # W3^T
                pl.BlockSpec(memory_space=pltpu.MemorySpace.SMEM),          # b3 scalar
            ],
            out_specs=pl.BlockSpec((1, 1, tb), lambda i: (i, 0, 0)),        # lane-dense
        ),
        compiler_params=pltpu.CompilerParams(
            dimension_semantics=("parallel",)),
        cost_estimate=cost,
    )(x_in, w1b, b1f, w2b, b2f, w3t, b3f)

    return out3.reshape(b_pad, 1)[:B]


def init_params(key, input_dim=INPUT_DIM, hidden_dim=HIDDEN_DIM):
    """Deterministic init mimicking PyTorch nn.Linear default
    (uniform(-1/sqrt(fan_in), 1/sqrt(fan_in))). Weights stored as
    (in_features, out_features); biases as (1, out_features)."""
    def linear(key, fan_in, fan_out):
        kw, kb = jax.random.split(key)
        bound = 1.0 / jnp.sqrt(fan_in)
        w = jax.random.uniform(kw, (fan_in, fan_out), jnp.float32, -bound, bound)
        b = jax.random.uniform(kb, (1, fan_out), jnp.float32, -bound, bound)
        return w, b

    k1, k2, k3 = jax.random.split(key, 3)
    w1, b1 = linear(k1, input_dim, hidden_dim)
    w2, b2 = linear(k2, hidden_dim, hidden_dim)
    w3, b3 = linear(k3, hidden_dim, 1)
    return (w1, b1, w2, b2, w3, b3)


if __name__ == "__main__":
    key = jax.random.PRNGKey(0)
    kx, kp = jax.random.split(key)

    batch = 128
    x = jax.random.normal(kx, (batch, INPUT_DIM), dtype=jnp.float32)
    params = init_params(kp)

    out = mlp_forward(x, params)
    out = jax.block_until_ready(out)
    assert out.shape == (batch, 1)

    w1, b1, w2, b2, w3, b3 = params

    # Reference 1: same bf16-matmul / f32-accumulate math as the kernel.
    xb = x.astype(jnp.bfloat16)
    h1 = jnp.maximum(jnp.dot(xb, w1.astype(jnp.bfloat16),
                             preferred_element_type=jnp.float32) + b1, 0.0)
    h2 = jnp.maximum(jnp.dot(h1.astype(jnp.bfloat16), w2.astype(jnp.bfloat16),
                             preferred_element_type=jnp.float32) + b2, 0.0)
    ref_bf16 = jnp.dot(h2.astype(jnp.bfloat16), w3.astype(jnp.bfloat16),
                       preferred_element_type=jnp.float32) + b3
    assert jnp.allclose(out, ref_bf16, atol=2e-3, rtol=2e-3)

    # Reference 2: full-f32 PyTorch-equivalent forward (loose tol: bf16 matmuls
    # in the kernel are a deliberate precision trade).
    ref_f32 = jnp.maximum(x @ w1 + b1, 0.0)
    ref_f32 = jnp.maximum(ref_f32 @ w2 + b2, 0.0)
    ref_f32 = ref_f32 @ w3 + b3
    assert jnp.allclose(out, ref_f32, atol=5e-2, rtol=5e-2)

    print("KERNEL_OK")
</pallas_src>

<mosaic_0001>
module attributes {stable_mosaic.version = 11 : i64} {
  func.func @mlp_kernel(%arg0: i32, %arg1: memref<128x8xbf16, #tpu.memory_space<vmem>>, %arg2: memref<8x64xbf16, #tpu.memory_space<vmem>>, %arg3: memref<1x64xf32, #tpu.memory_space<vmem>>, %arg4: memref<64x64xbf16, #tpu.memory_space<vmem>>, %arg5: memref<1x64xf32, #tpu.memory_space<vmem>>, %arg6: memref<1x64xbf16, #tpu.memory_space<vmem>>, %arg7: memref<1x1xf32, #tpu.memory_space<smem>>, %arg8: memref<1x1x128xf32, #tpu.memory_space<vmem>>) attributes {dimension_semantics = [#tpu.dimension_semantics<parallel>], iteration_bounds = array<i64: 1>, scalar_prefetch = 0 : i64, scratch_operands = 0 : i64, tpu.core_type = #tpu.core_type<tc>, window_params = [{transform_indices = @transform_0, window_bounds = array<i64: 128, 8>}, {pipeline_mode = #tpu.pipeline_mode<synchronous>, transform_indices = @transform_1, window_bounds = array<i64: 8, 64>}, {pipeline_mode = #tpu.pipeline_mode<synchronous>, transform_indices = @transform_2, window_bounds = array<i64: 1, 64>}, {pipeline_mode = #tpu.pipeline_mode<synchronous>, transform_indices = @transform_3, window_bounds = array<i64: 64, 64>}, {pipeline_mode = #tpu.pipeline_mode<synchronous>, transform_indices = @transform_4, window_bounds = array<i64: 1, 64>}, {pipeline_mode = #tpu.pipeline_mode<synchronous>, transform_indices = @transform_5, window_bounds = array<i64: 1, 64>}, {transform_indices = @transform_6, window_bounds = array<i64: 1, 1>}, {transform_indices = @transform_7, window_bounds = array<i64: 1, 1, 128>}]} {
    %c0 = arith.constant 0 : index
    %c0_0 = arith.constant 0 : index
    %0 = vector.load %arg2[%c0, %c0_0] : memref<8x64xbf16, #tpu.memory_space<vmem>>, vector<8x64xbf16>
    %c0_1 = arith.constant 0 : index
    %c0_2 = arith.constant 0 : index
    %1 = vector.load %arg3[%c0_1, %c0_2] : memref<1x64xf32, #tpu.memory_space<vmem>>, vector<1x64xf32>
    %c0_3 = arith.constant 0 : index
    %c0_4 = arith.constant 0 : index
    %2 = vector.load %arg4[%c0_3, %c0_4] : memref<64x64xbf16, #tpu.memory_space<vmem>>, vector<64x64xbf16>
    %c0_5 = arith.constant 0 : index
    %c0_6 = arith.constant 0 : index
    %3 = vector.load %arg5[%c0_5, %c0_6] : memref<1x64xf32, #tpu.memory_space<vmem>>, vector<1x64xf32>
    %c0_7 = arith.constant 0 : index
    %c0_8 = arith.constant 0 : index
    %4 = vector.load %arg6[%c0_7, %c0_8] : memref<1x64xbf16, #tpu.memory_space<vmem>>, vector<1x64xbf16>
    %c0_9 = arith.constant 0 : index
    %c0_10 = arith.constant 0 : index
    %5 = memref.load %arg7[%c0_9, %c0_10] : memref<1x1xf32, #tpu.memory_space<smem>>
    %c0_11 = arith.constant 0 : index
    %c0_12 = arith.constant 0 : index
    %6 = vector.load %arg1[%c0_11, %c0_12] : memref<128x8xbf16, #tpu.memory_space<vmem>>, vector<128x8xbf16>
    %cst = arith.constant dense<0.000000e+00> : vector<128x64xf32>
    %7 = tpu.matmul %6, %0, %cst {dimension_numbers = #tpu.dot_dimension_numbers<[1], [0], [0], [1], [0, 0, 1, 1], [], []>} : vector<128x8xbf16>, vector<8x64xbf16>, vector<128x64xf32> -> vector<128x64xf32>
    %8 = vector.broadcast %1 : vector<1x64xf32> to vector<128x64xf32>
    %9 = arith.addf %7, %8 : vector<128x64xf32>
    %cst_13 = arith.constant 0.000000e+00 : f32
    %10 = vector.broadcast %cst_13 : f32 to vector<128x64xf32>
    %11 = arith.maximumf %9, %10 : vector<128x64xf32>
    %12 = arith.truncf %11 : vector<128x64xf32> to vector<128x64xbf16>
    %cst_14 = arith.constant dense<0.000000e+00> : vector<128x64xf32>
    %13 = tpu.matmul %12, %2, %cst_14 {dimension_numbers = #tpu.dot_dimension_numbers<[1], [0], [0], [1], [0, 0, 1, 1], [], []>} : vector<128x64xbf16>, vector<64x64xbf16>, vector<128x64xf32> -> vector<128x64xf32>
    %14 = vector.broadcast %3 : vector<1x64xf32> to vector<128x64xf32>
    %15 = arith.addf %13, %14 : vector<128x64xf32>
    %cst_15 = arith.constant 0.000000e+00 : f32
    %16 = vector.broadcast %cst_15 : f32 to vector<128x64xf32>
    %17 = arith.maximumf %15, %16 : vector<128x64xf32>
    %18 = arith.truncf %17 : vector<128x64xf32> to vector<128x64xbf16>
    %cst_16 = arith.constant dense<0.000000e+00> : vector<1x128xf32>
    %19 = tpu.matmul %4, %18, %cst_16 {dimension_numbers = #tpu.dot_dimension_numbers<[1], [1], [0], [0], [0, 0, 1, 0], [], []>} : vector<1x64xbf16>, vector<128x64xbf16>, vector<1x128xf32> -> vector<1x128xf32>
    %20 = vector.broadcast %5 : f32 to vector<1x128xf32>
    %21 = arith.addf %19, %20 : vector<1x128xf32>
    %c0_17 = arith.constant 0 : index
    %c0_18 = arith.constant 0 : index
    %c0_19 = arith.constant 0 : index
    %22 = vector.load %arg8[%c0_17, %c0_18, %c0_19] : memref<1x1x128xf32, #tpu.memory_space<vmem>>, vector<1x1x128xf32>
    %23 = vector.shape_cast %22 : vector<1x1x128xf32> to vector<1x128xf32>
    %24 = vector.shape_cast %21 : vector<1x128xf32> to vector<1x1x128xf32>
    tpu.vector_store %arg8[%c0_17, %c0_18, %c0_19], %24 {strides = array<i32>} : memref<1x1x128xf32, #tpu.memory_space<vmem>>, vector<1x1x128xf32>,
    return
  }
  func.func @transform_0(%arg0: i32) -> (i32, i32) {
    %c0_i32 = arith.constant 0 : i32
    %c0_i32_0 = arith.constant 0 : i32
    return %arg0, %c0_i32 : i32, i32
  }
  func.func @transform_1(%arg0: i32) -> (i32, i32) {
    %c0_i32 = arith.constant 0 : i32
    %c0_i32_0 = arith.constant 0 : i32
    %c0_i32_1 = arith.constant 0 : i32
    return %c0_i32, %c0_i32_0 : i32, i32
  }
  func.func @transform_2(%arg0: i32) -> (i32, i32) {
    %c0_i32 = arith.constant 0 : i32
    %c0_i32_0 = arith.constant 0 : i32
    %c0_i32_1 = arith.constant 0 : i32
    return %c0_i32, %c0_i32_0 : i32, i32
  }
  func.func @transform_3(%arg0: i32) -> (i32, i32) {
    %c0_i32 = arith.constant 0 : i32
    %c0_i32_0 = arith.constant 0 : i32
    %c0_i32_1 = arith.constant 0 : i32
    return %c0_i32, %c0_i32_0 : i32, i32
  }
  func.func @transform_4(%arg0: i32) -> (i32, i32) {
    %c0_i32 = arith.constant 0 : i32
    %c0_i32_0 = arith.constant 0 : i32
    %c0_i32_1 = arith.constant 0 : i32
    return %c0_i32, %c0_i32_0 : i32, i32
  }
  func.func @transform_5(%arg0: i32) -> (i32, i32) {
    %c0_i32 = arith.constant 0 : i32
    %c0_i32_0 = arith.constant 0 : i32
    %c0_i32_1 = arith.constant 0 : i32
    return %c0_i32, %c0_i32_0 : i32, i32
  }
  func.func @transform_6(%arg0: i32) -> (i32, i32) {
    %c0_i32 = arith.constant 0 : i32
    %c0_i32_0 = arith.constant 0 : i32
    %c0_i32_1 = arith.constant 0 : i32
    return %c0_i32, %c0_i32_0 : i32, i32
  }
  func.func @transform_7(%arg0: i32) -> (i32, i32, i32) {
    %c0_i32 = arith.constant 0 : i32
    %c0_i32_0 = arith.constant 0 : i32
    %c0_i32_1 = arith.constant 0 : i32
    return %arg0, %c0_i32, %c0_i32_0 : i32, i32, i32
  }
}

</mosaic_0001>

<bundles_post_ra>
// kernel: tpu_custom_call.1
= control target key start
LH: loop header
LB: loop body
LE: loop exit
PB: predicated region body
PF: predicated region fallthrough
CT: control target
= control target key end

     0   :  { %vm129_vm0 = vcmask 1043456   ;;  %vm104_vm1 = vcmask 64512   ;;  %s816_s0 = inlined_call_operand.vmem [shape: bf16[128,8], index: 0, kind: input, shape index: {}]   ;;  %s817_s1 = inlined_call_operand.vmem [shape: bf16[8,64], index: 1, kind: input, shape index: {}]   ;;  %s818_s2 = inlined_call_operand.vmem [shape: f32[1,64], index: 2, kind: input, shape index: {}]   ;;  %s819_s3 = inlined_call_operand.vmem [shape: bf16[64,64], index: 3, kind: input, shape index: {}]   ;;  %s820_s4 = inlined_call_operand.vmem [shape: f32[1,64], index: 4, kind: input, shape index: {}]   ;;  %s821_s5 = inlined_call_operand.vmem [shape: bf16[1,64], index: 5, kind: input, shape index: {}]   ;;  %s822_s6 = inlined_call_operand.<no memory space> [shape: f32[1,1], index: 6, kind: input, shape index: {}]   ;;  %s823_s7 = inlined_call_operand.hbm [shape: f32[1,1,128], index: 7, kind: output, shape index: {}]  }
   0x1   :  { %v29_v0 = vld [vmem:[%s817_s1] sm:$0xf]  ;;  %v641_v3 = vld [vmem:[%s816_s0 + $0x8] sm:$0xff]   ;;  %v642_v4 = vld [vmem:[%s816_s0 + $0x10] sm:$0xff]  }
   0x2   :  { %v640_v1 = vld [vmem:[%s816_s0] sm:$0xff]   ;;  %636 = vmatprep.subr.msk.bf16.mxu1 %vm129_vm0, %v29_v0  ;;  %v131_v2 = vsel %vm129_vm0, %v29_v0, 0  ;;  %v643_v5 = vld [vmem:[%s816_s0 + $0x18] sm:$0xff]   ;;  %v649_v8 = vld [vmem:[%s819_s3 + $0x8] sm:$0xff]  }
   0x3   :  { %575 = vmatpush3.bf16.msra.mxu1 %v131_v2  ;;  %576 = vmatprep.mubr.msk.bf16.mxu1 %vm104_vm1, %v640_v1  ;;  %v644_v6 = vld [vmem:[%s816_s0 + $0x20] sm:$0xff]  }
   0x4   :  { %v648_v7 = vld [vmem:[%s819_s3] sm:$0xff]  }
   0x5   :  { %592 = vmatprep.subr.bf16.mxu1 %v648_v7 }
   0x6   :  { %577 = vmatmul.mubr.msk.bf16.vlgmr.msra.gmra.mrb[0].mxu1 %vm104_vm1, %v641_v3 }
   0x7   :  { %580 = vmatprep.mubr.msk.bf16.mxu1 %vm104_vm1, %v642_v4  ;;  %593 = vmatpush3.bf16.msra.mxu1 %v648_v7 }
   0x8   :  { %13 = vsyncpa [#allocation4], 0  ;;  %594 = vmatprep.subr.bf16.mxu1 %v649_v8  ;;  %v650_v9 = vld [vmem:[%s819_s3 + $0x10] sm:$0xff]   ;;  %v645_v10 = vld [vmem:[%s816_s0 + $0x28] sm:$0xff]   ;;  %vm284_vm2 = vcmask 523264   ;;  %v676_v7 = vmov 0.0  }
   0x9   :  { %v646_v11 = vld [vmem:[%s816_s0 + $0x30] sm:$0xff]   ;;  %v647_v12 = vld [vmem:[%s816_s0 + $0x38] sm:$0xff]   ;;  %v513_v14 = vld [vmem:[%s818_s2] ss:$0 sm:$0xff]  ;;  %616 = vmatprep.subr.bf16.mxu0 %v676_v7  ;;  %vm677_vm3 = vmmov 0   ;;  %s678_s30 = smov [#allocation3]  }
   0xa   :  { %v651_v13 = vld [vmem:[%s819_s3 + $0x18] sm:$0xff]   ;;  %632 = vmatprep.mubr.msk.bf16.mxu0 %vm677_vm3, %v676_v7  ;;  %s505_s8 = sshll.u32 %s678_s30, 4  ;;  %s506_s8 = int_to_ptr.vmem [resolvable:$true] %s505_s8 }
   0xb   :  { %595 = vmatpush3.bf16.msra.mxu1 %v649_v8  ;;  %v530_v8 = vld [vmem:[%s820_s4] ss:$0 sm:$0xff]  ;;  %s652_s1 = scalar_lea.vmem %s506_s8, 16  ;;  %s656_s9 = scalar_lea.vmem %s506_s8, 32 }
   0xc   :  { %596 = vmatprep.subr.bf16.mxu1 %v650_v9  ;;  %p653_p0 = scmp.ne.s32.totalorder %s506_s8, %s652_s1  ;;  %p657_p1 = scmp.lt.s32.totalorder %s506_s8, %s506_s8 }
   0xd   :  { %p658_p2 = scmp.lt.s32.totalorder %s656_s9, %s652_s1 }
   0xe   :  { %581 = vmatmul.mubr.msk.bf16.gmra.mrb[4].mxu1 %vm104_vm1, %v643_v5 }
   0xf   :  { %584 = vmatprep.mubr.msk.bf16.mxu1 %vm104_vm1, %v644_v6  ;;  %597 = vmatpush3.bf16.msra.mxu1 %v650_v9  ;;  %p659_p3 = por %p658_p2, %p657_p1 }
  0x10   :  { %598 = vmatprep.subr.bf16.mxu1 %v651_v13 }
  0x11   :  { %p660_p4 = pnand %p659_p3, %p653_p0 }
  0x13   :  { %599 = vmatpush3.bf16.msra.mxu1 %v651_v13 }
  0x16   :  { %585 = vmatmul.mubr.msk.bf16.gmra.mrb[8].mxu1 %vm104_vm1, %v645_v10 }
  0x17   :  { %588 = vmatprep.mubr.msk.bf16.mxu1 %vm104_vm1, %v646_v11 }
  0x1e   :  { %589 = vmatmul.mubr.msk.bf16.gmra.mrb[12].mxu1 %vm104_vm1, %v647_v12 }
  0xd9   :  { %v578_v15 = vpop.f32.mrb[0].mxu1 }
  0xda   :  { %v176_v16 = vadd.f32 %v578_v15, %v513_v14  ;;  %v167_v17 = vpop.f32.mrb[1].mxu1 }
  0xdb   :  { %v168_v18 = vadd.f32 %v513_v14, %v167_v17  ;;  %v579_v19 = vpop.f32.mrb[2].mxu1 }
  0xdc   :  { %v179_v20 = vadd.f32 %v579_v19, %v513_v14  ;;  %v170_v21 = vpop.f32.mrb[3].mxu1  ;;  %v232_v23 = vmax.f32 %v176_v16, 0.0 }
  0xdd   :  { %v171_v22 = vadd.f32 %v513_v14, %v170_v21  ;;  %v230_v25 = vmax.f32 %v168_v18, 0.0 }
  0xde   :  { %v233_v24 = vmax.f32 %v179_v20, 0.0 }
  0xdf   :  { %v231_v26 = vmax.f32 %v171_v22, 0.0 }
  0xe0   :  { %v247_v27 = vpack.c.bf16 %v233_v24, %v232_v23 }
  0xe1   :  { %v246_v28 = vpack.c.bf16 %v231_v26, %v230_v25  ;;  %v582_v29 = vpop.f32.mrb[4].mxu1 }
  0xe2   :  { %v192_v30 = vadd.f32 %v582_v29, %v513_v14  ;;  %v183_v31 = vpop.f32.mrb[5].mxu1 }
  0xe3   :  { %v184_v32 = vadd.f32 %v513_v14, %v183_v31  ;;  %600 = vmatprep.mubr.msk.bf16.mxu1 %vm284_vm2, %v246_v28  ;;  %v583_v33 = vpop.f32.mrb[6].mxu1 }
  0xe4   :  { %v236_v34 = vmax.f32 %v192_v30, 0.0  ;;  %v195_v35 = vadd.f32 %v583_v33, %v513_v14  ;;  %601 = vmatmul.mubr.msk.bf16.vlgmr.msra.gmra.mrb[16].mxu1 %vm284_vm2, %v247_v27  ;;  %v186_v36 = vpop.f32.mrb[7].mxu1 }
  0xe5   :  { %v234_v37 = vmax.f32 %v184_v32, 0.0  ;;  %v187_v38 = vadd.f32 %v513_v14, %v186_v36 }
  0xe6   :  { %v237_v39 = vmax.f32 %v195_v35, 0.0 }
  0xe7   :  { %v235_v40 = vmax.f32 %v187_v38, 0.0 }
  0xe8   :  { %v249_v41 = vpack.c.bf16 %v237_v39, %v236_v34 }
  0xe9   :  { %v248_v42 = vpack.c.bf16 %v235_v40, %v234_v37  ;;  %v586_v43 = vpop.f32.mrb[8].mxu1 }
  0xea   :  { %v208_v44 = vadd.f32 %v586_v43, %v513_v14  ;;  %v199_v45 = vpop.f32.mrb[9].mxu1 }
  0xeb   :  { %604 = vmatprep.mubr.msk.bf16.mxu1 %vm284_vm2, %v248_v42  ;;  %v200_v46 = vadd.f32 %v513_v14, %v199_v45  ;;  %v587_v47 = vpop.f32.mrb[10].mxu1 }
  0xec   :  { %605 = vmatmul.mubr.msk.bf16.gmra.mrb[20].mxu1 %vm284_vm2, %v249_v41  ;;  %v240_v48 = vmax.f32 %v208_v44, 0.0  ;;  %v211_v49 = vadd.f32 %v587_v47, %v513_v14  ;;  %v202_v50 = vpop.f32.mrb[11].mxu1 }
  0xed   :  { %v238_v51 = vmax.f32 %v200_v46, 0.0  ;;  %v203_v52 = vadd.f32 %v513_v14, %v202_v50 }
  0xee   :  { %v241_v53 = vmax.f32 %v211_v49, 0.0 }
  0xef   :  { %v239_v54 = vmax.f32 %v203_v52, 0.0 }
  0xf0   :  { %v251_v55 = vpack.c.bf16 %v241_v53, %v240_v48 }
  0xf1   :  { %v250_v56 = vpack.c.bf16 %v239_v54, %v238_v51  ;;  %v590_v57 = vpop.f32.mrb[12].mxu1 }
  0xf2   :  { %v224_v58 = vadd.f32 %v590_v57, %v513_v14  ;;  %v215_v59 = vpop.f32.mrb[13].mxu1 }
  0xf3   :  { %608 = vmatprep.mubr.msk.bf16.mxu1 %vm284_vm2, %v250_v56  ;;  %v216_v60 = vadd.f32 %v513_v14, %v215_v59  ;;  %v591_v61 = vpop.f32.mrb[14].mxu1 }
  0xf4   :  { %609 = vmatmul.mubr.msk.bf16.gmra.mrb[24].mxu1 %vm284_vm2, %v251_v55  ;;  %v244_v62 = vmax.f32 %v224_v58, 0.0  ;;  %v227_v63 = vadd.f32 %v591_v61, %v513_v14  ;;  %v218_v0 = vpop.f32.mrb[15].mxu1 }
  0xf5   :  { %v242_v1 = vmax.f32 %v216_v60, 0.0  ;;  %v219_v2 = vadd.f32 %v513_v14, %v218_v0 }
  0xf6   :  { %v245_v3 = vmax.f32 %v227_v63, 0.0 }
  0xf7   :  { %v243_v4 = vmax.f32 %v219_v2, 0.0 }
  0xf8   :  { %v253_v5 = vpack.c.bf16 %v245_v3, %v244_v62 }
  0xf9   :  { %v252_v6 = vpack.c.bf16 %v243_v4, %v242_v1 }
  0xfb   :  { %612 = vmatprep.mubr.msk.bf16.mxu1 %vm284_vm2, %v252_v6 }
  0xfc   :  { %613 = vmatmul.mubr.msk.bf16.gmra.mrb[28].mxu1 %vm284_vm2, %v253_v5 }
 0x1b7   :  { %v602_v9 = vpop.f32.mrb[16].mxu1 }
 0x1b8   :  { %v352_v10 = vadd.f32 %v602_v9, %v530_v8  ;;  %v343_v11 = vpop.f32.mrb[17].mxu1 }
 0x1b9   :  { %v344_v12 = vadd.f32 %v530_v8, %v343_v11  ;;  %v603_v13 = vpop.f32.mrb[18].mxu1  ;;  %v430_v11 = vstv %s822_s6 }
 0x1ba   :  { %v355_v14 = vadd.f32 %v603_v13, %v530_v8  ;;  %v346_v15 = vpop.f32.mrb[19].mxu1  ;;  %v408_v17 = vmax.f32 %v352_v10, 0.0  ;;  %v40_v10 = vld [vmem:[%s821_s5] sm:$0x1] }
 0x1bb   :  { %v347_v16 = vadd.f32 %v530_v8, %v346_v15  ;;  %v406_v19 = vmax.f32 %v344_v12, 0.0 }
 0x1bc   :  { %v409_v18 = vmax.f32 %v355_v14, 0.0 }
 0x1bd   :  { %v407_v20 = vmax.f32 %v347_v16, 0.0 }
 0x1be   :  { %v423_v21 = vpack.c.bf16 %v409_v18, %v408_v17 }
 0x1bf   :  { %v606_v22 = vpop.f32.mrb[20].mxu1  ;;  %v422_v23 = vpack.c.bf16 %v407_v20, %v406_v19 }
 0x1c0   :  { %v368_v24 = vadd.f32 %v606_v22, %v530_v8  ;;  %v359_v25 = vpop.f32.mrb[21].mxu1  ;;  %v438_v41 = vsel %vm284_vm2, %v423_v21, 0 }
 0x1c1   :  { %v360_v26 = vadd.f32 %v530_v8, %v359_v25  ;;  %v607_v27 = vpop.f32.mrb[22].mxu1  ;;  %v435_v28 = vsel %vm284_vm2, %v422_v23, 0 }
 0x1c2   :  { %v412_v29 = vmax.f32 %v368_v24, 0.0  ;;  %v371_v30 = vadd.f32 %v607_v27, %v530_v8  ;;  %617 = vmatpush3.bf16.xpose.msra.mxu0 %v435_v28  ;;  %v362_v31 = vpop.f32.mrb[23].mxu1 }
 0x1c3   :  { %v410_v32 = vmax.f32 %v360_v26, 0.0  ;;  %v363_v33 = vadd.f32 %v530_v8, %v362_v31  ;;  %618 = vmatprep.subr.bf16.mxu0 %v676_v7 }
 0x1c4   :  { %v413_v34 = vmax.f32 %v371_v30, 0.0 }
 0x1c5   :  { %v411_v35 = vmax.f32 %v363_v33, 0.0 }
 0x1c6   :  { %v425_v36 = vpack.c.bf16 %v413_v34, %v412_v29 }
 0x1c7   :  { %v424_v37 = vpack.c.bf16 %v411_v35, %v410_v32  ;;  %v610_v38 = vpop.f32.mrb[24].mxu1 }
 0x1c8   :  { %v384_v39 = vadd.f32 %v610_v38, %v530_v8  ;;  %v375_v40 = vpop.f32.mrb[25].mxu1  ;;  %v444_v4 = vsel %vm284_vm2, %v425_v36, 0 }
 0x1c9   :  { %v376_v42 = vadd.f32 %v530_v8, %v375_v40  ;;  %v611_v43 = vpop.f32.mrb[26].mxu1  ;;  %v441_v56 = vsel %vm284_vm2, %v424_v37, 0 }
 0x1ca   :  { %619 = vmatpush3.bf16.xpose.msra.mxu0 %v438_v41  ;;  %v416_v44 = vmax.f32 %v384_v39, 0.0  ;;  %v387_v45 = vadd.f32 %v611_v43, %v530_v8  ;;  %v378_v46 = vpop.f32.mrb[27].mxu1 }
 0x1cb   :  { %v414_v47 = vmax.f32 %v376_v42, 0.0  ;;  %620 = vmatprep.subr.bf16.mxu0 %v676_v7  ;;  %v379_v48 = vadd.f32 %v530_v8, %v378_v46 }
 0x1cc   :  { %v417_v49 = vmax.f32 %v387_v45, 0.0 }
 0x1cd   :  { %v415_v50 = vmax.f32 %v379_v48, 0.0 }
 0x1ce   :  { %v427_v51 = vpack.c.bf16 %v417_v49, %v416_v44 }
 0x1cf   :  { %v426_v52 = vpack.c.bf16 %v415_v50, %v414_v47  ;;  %v614_v53 = vpop.f32.mrb[28].mxu1 }
 0x1d0   :  { %v400_v54 = vadd.f32 %v614_v53, %v530_v8  ;;  %v391_v55 = vpop.f32.mrb[29].mxu1  ;;  %v450_v6 = vsel %vm284_vm2, %v427_v51, 0 }
 0x1d1   :  { %v392_v57 = vadd.f32 %v530_v8, %v391_v55  ;;  %v615_v58 = vpop.f32.mrb[30].mxu1  ;;  %v447_v5 = vsel %vm284_vm2, %v426_v52, 0 }
 0x1d2   :  { %621 = vmatpush3.bf16.xpose.msra.mxu0 %v441_v56  ;;  %v420_v59 = vmax.f32 %v400_v54, 0.0  ;;  %v403_v60 = vadd.f32 %v615_v58, %v530_v8  ;;  %v394_v61 = vpop.f32.mrb[31].mxu1 }
 0x1d3   :  { %622 = vmatprep.subr.bf16.mxu0 %v676_v7  ;;  %v418_v62 = vmax.f32 %v392_v57, 0.0  ;;  %v395_v63 = vadd.f32 %v530_v8, %v394_v61 }
 0x1d4   :  { %v421_v0 = vmax.f32 %v403_v60, 0.0 }
 0x1d5   :  { %v419_v1 = vmax.f32 %v395_v63, 0.0 }
 0x1d6   :  { %v429_v2 = vpack.c.bf16 %v421_v0, %v420_v59 }
 0x1d7   :  { %v428_v3 = vpack.c.bf16 %v419_v1, %v418_v62 }
 0x1d8   :  { %v456_v9 = vsel %vm284_vm2, %v429_v2, 0 }
 0x1d9   :  { %v453_v8 = vsel %vm284_vm2, %v428_v3, 0 }
 0x1da   :  { %623 = vmatpush3.bf16.xpose.msra.mxu0 %v444_v4 }
 0x1db   :  { %624 = vmatprep.subr.bf16.mxu0 %v676_v7 }
 0x1e2   :  { %625 = vmatpush3.bf16.xpose.msra.mxu0 %v447_v5 }
 0x1e3   :  { %626 = vmatprep.subr.bf16.mxu0 %v676_v7 }
 0x1ea   :  { %627 = vmatpush3.bf16.xpose.msra.mxu0 %v450_v6 }
 0x1eb   :  { %628 = vmatprep.subr.bf16.mxu0 %v676_v7 }
 0x1f2   :  { %629 = vmatpush3.bf16.xpose.msra.mxu0 %v453_v8 }
 0x1f3   :  { %630 = vmatprep.subr.bf16.mxu0 %v676_v7 }
 0x1fa   :  { %631 = vmatpush3.bf16.xpose.msra.mxu0 %v456_v9 }
 0x201   :  { %633 = vmatmul.mubr.msk.bf16.vlgmr.msra.gmra.mrb[0].mxu0 %vm284_vm2, %v40_v10 }
 0x2d4   :  { %v492_v12 = vpop.f32.mrb[0].mxu0 }
 0x2d5   :  { %v493_v13 = vadd.f32 %v492_v12, %v430_v11  ;;  %v634_v14 = vpop.f32.mrb[1].mxu0 }
 0x2d6   :  { %v495_v7 = vpop.f32.mrb[2].mxu0 }
 0x2d7   :  { %498 = vst [vmem:[#allocation3] sm:$0x1] %v493_v13  ;;  %v635_v15 = vpop.f32.mrb[3].mxu0 }
 0x2d8   :  { %663 = shalt.err (!%p660_p4)
}
 0x2d9   :  { %s664_s6 = scalar_lea.hbm %s823_s7, 16 }
 0x2da   :  { %p665_p5 = scmp.ne.s32.totalorder %s823_s7, %s664_s6  ;;  %p668_p6 = scmp.lt.u32.totalorder %s664_s6, %s823_s7 }
 0x2dc   :  { %p670_p7 = pnand %p668_p6, %p665_p5 }
 0x2de   :  { %673 = shalt.err (!%p670_p7)
}
 0x2df   :  { %508 = dma.vmem_to_hbm [thread:$0]  %s506_s8, 16, %s823_s7, [#allocation4]  }
 0x2e0   :  { %674 = dma.done.wait [#allocation4], 16  }
 0x2e1   :  { %675 = vsyncadd [#allocation4], 4294967280 }
 0x2e2   :  { %512 = vsyncpa [#allocation4], 1 }

</bundles_post_ra>
